<compile_context>
chip_gen: v6e
topology: v6e:2x2x1
jax: 0.10.0
libtpu: 0.0.40
codegen_flags: <defaults>
</compile_context>

<pallas_src>
import functools

import jax
import jax.numpy as jnp
from jax.experimental import pallas as pl
from jax.experimental.pallas import tpu as pltpu


def _round_up(n, m):
    return ((n + m - 1) // m) * m


def _mlp_kernel(x_ref, w1_ref, w2_ref, w3_ref, w4_ref, b_ref, o_ref):
    """Fused 4-layer MLP on one (TM, 768) tile of embeddings.

    x_ref:  (TM, 768)      bf16
    w*_ref: (in_p, out_p)  bf16   (lane-padded, resident across grid steps)
    b_ref:  (8, MAXPAD)    f32    rows 0..3 = b1..b4 (zero padded)
    o_ref:  (TM, C_pad)    f32
    """
    h1p = w1_ref.shape[1]
    h2p = w2_ref.shape[1]
    cp = w4_ref.shape[1]
    f32 = jnp.float32
    bf16 = jnp.bfloat16

    b1 = b_ref[0:1, :h1p]
    b2 = b_ref[1:2, :h2p]
    b3 = b_ref[2:3, :h1p]
    b4 = b_ref[3:4, :cp]

    # Layer 1: (TM,768) @ (768,H_p) -> f32, bias + ReLU in f32.
    h = jnp.dot(x_ref[...], w1_ref[...], preferred_element_type=f32)
    h = jnp.maximum(h + b1, 0.0)
    # Layer 2: (TM,H_p) @ (H_p,2H_p)
    h = jnp.dot(h.astype(bf16), w2_ref[...], preferred_element_type=f32)
    h = jnp.maximum(h + b2, 0.0)
    # Layer 3: (TM,2H_p) @ (2H_p,H_p)
    h = jnp.dot(h.astype(bf16), w3_ref[...], preferred_element_type=f32)
    h = jnp.maximum(h + b3, 0.0)
    # Layer 4 (logits): (TM,H_p) @ (H_p,C_p)
    h = jnp.dot(h.astype(bf16), w4_ref[...], preferred_element_type=f32)
    o_ref[...] = (h + b4).astype(o_ref.dtype)


def prepare_params(params):
    """Pad lane dims to multiples of 128, cast weights to bf16, pack biases.

    Call once; the prepared dict can be reused across forward calls so the
    padding/cast cost is not paid per invocation.  `num_classes` stays a plain
    Python int (never passed through jit).
    """
    w1, w2, w3, w4 = params["w1"], params["w2"], params["w3"], params["w4"]
    b1, b2, b3, b4 = params["b1"], params["b2"], params["b3"], params["b4"]
    d_in = w1.shape[0]
    h1, h2, c = w1.shape[1], w2.shape[1], w4.shape[1]
    h1p, h2p, cp = _round_up(h1, 128), _round_up(h2, 128), _round_up(c, 128)
    maxp = max(h1p, h2p, cp)

    def pad_w(w, rows, cols):
        out = jnp.zeros((rows, cols), jnp.bfloat16)
        return out.at[: w.shape[0], : w.shape[1]].set(w.astype(jnp.bfloat16))

    bias = jnp.zeros((8, maxp), jnp.float32)
    bias = bias.at[0, :h1].set(b1.reshape(-1))
    bias = bias.at[1, :h2].set(b2.reshape(-1))
    bias = bias.at[2, :h1].set(b3.reshape(-1))
    bias = bias.at[3, :c].set(b4.reshape(-1))

    return {
        "w1": pad_w(w1, d_in, h1p),
        "w2": pad_w(w2, h1p, h2p),
        "w3": pad_w(w3, h2p, h1p),
        "w4": pad_w(w4, h1p, cp),
        "b": bias,
        "num_classes": int(c),
    }


@functools.partial(jax.jit, static_argnames=("num_classes", "tm"))
def _forward_impl(x, w1, w2, w3, w4, bias, *, num_classes, tm):
    """x: (B, 768) f32.  Returns (B, num_classes) f32 logits."""
    b, d = x.shape
    bp = _round_up(b, tm)
    if bp != b:
        x = jnp.pad(x, ((0, bp - b), (0, 0)))
    x = x.astype(jnp.bfloat16)

    h1p, h2p, cp = w1.shape[1], w2.shape[1], w4.shape[1]

    flops = 2 * bp * (d * h1p + h1p * h2p + h2p * h1p + h1p * cp)
    bytes_accessed = (
        x.size * 2
        + (w1.size + w2.size + w3.size + w4.size) * 2
        + bias.size * 4
        + bp * cp * 4
    )

    out = pl.pallas_call(
        _mlp_kernel,
        out_shape=jax.ShapeDtypeStruct((bp, cp), jnp.float32),
        grid_spec=pltpu.PrefetchScalarGridSpec(
            num_scalar_prefetch=0,
            grid=(bp // tm,),
            in_specs=[
                pl.BlockSpec((tm, d), lambda i: (i, 0)),       # x tile per step
                pl.BlockSpec((d, h1p), lambda i: (0, 0)),      # weights resident
                pl.BlockSpec((h1p, h2p), lambda i: (0, 0)),
                pl.BlockSpec((h2p, h1p), lambda i: (0, 0)),
                pl.BlockSpec((h1p, cp), lambda i: (0, 0)),
                pl.BlockSpec((8, bias.shape[1]), lambda i: (0, 0)),
            ],
            out_specs=pl.BlockSpec((tm, cp), lambda i: (i, 0)),
        ),
        compiler_params=pltpu.CompilerParams(
            dimension_semantics=("parallel",),
        ),
        cost_estimate=pl.CostEstimate(
            flops=flops, transcendentals=0, bytes_accessed=bytes_accessed
        ),
    )(x, w1, w2, w3, w4, bias)

    # Static slicing: b, num_classes are Python ints here (num_classes static).
    return out[:b, :num_classes]


def openai_text_model_forward(embeddings, prepared, tm=128):
    """embeddings: (768,) or (B, 768) f32; prepared: output of prepare_params."""
    single = embeddings.ndim == 1
    x = embeddings.reshape(1, -1) if single else embeddings
    num_classes = prepared["num_classes"]  # Python int, stays static.
    logits = _forward_impl(
        x,
        prepared["w1"],
        prepared["w2"],
        prepared["w3"],
        prepared["w4"],
        prepared["b"],
        num_classes=num_classes,
        tm=tm,
    )
    return logits.reshape(num_classes) if single else logits


def init_params(key, embed_dim=768, hidden_size=32, num_classes=10):
    """Deterministic init mimicking nn.Linear defaults (uniform +-1/sqrt(fan_in)).
    Weights stored transposed as (in_features, out_features)."""
    dims = [
        (embed_dim, hidden_size),
        (hidden_size, hidden_size * 2),
        (hidden_size * 2, hidden_size),
        (hidden_size, num_classes),
    ]
    params = {}
    for i, (fan_in, fan_out) in enumerate(dims, start=1):
        key, kw, kb = jax.random.split(key, 3)
        bound = 1.0 / (fan_in ** 0.5)
        params[f"w{i}"] = jax.random.uniform(
            kw, (fan_in, fan_out), jnp.float32, -bound, bound
        )
        params[f"b{i}"] = jax.random.uniform(
            kb, (fan_out,), jnp.float32, -bound, bound
        )
    return params


def _reference_forward(embeddings, params):
    """Pure-JAX reference with the same bf16-weight/activation quantization."""
    bf16 = jnp.bfloat16
    x = embeddings.reshape(1, -1) if embeddings.ndim == 1 else embeddings

    def layer(h, w, b, relu=True):
        h = jnp.dot(h.astype(bf16), w.astype(bf16),
                    preferred_element_type=jnp.float32) + b.reshape(1, -1)
        return jnp.maximum(h, 0.0) if relu else h

    h = layer(x, params["w1"], params["b1"])
    h = layer(h, params["w2"], params["b2"])
    h = layer(h, params["w3"], params["b3"])
    h = layer(h, params["w4"], params["b4"], relu=False)
    return h


if __name__ == "__main__":
    key = jax.random.PRNGKey(0)
    key, k_embed = jax.random.split(key)

    HIDDEN = 32        # small stand-in for hidden_size=512
    NUM_CLASSES = 10
    EMBED_DIM = 768    # text-embedding-3-small dimension
    BATCH = 256        # batched embeddings; grid of 2 with TM=128

    # TODO(synk): the OpenAI embeddings API call has no Pallas equivalent;
    # synthetic 768-dim embeddings stand in for response.data[*].embedding.
    embeddings = jax.random.normal(k_embed, (BATCH, EMBED_DIM), jnp.float32)

    params = init_params(key, EMBED_DIM, HIDDEN, NUM_CLASSES)
    prepared = prepare_params(params)

    # Batched path.
    logits = openai_text_model_forward(embeddings, prepared, tm=128)
    logits = jax.block_until_ready(logits)
    ref = _reference_forward(embeddings, params)
    assert logits.shape == (BATCH, NUM_CLASSES)
    assert jnp.allclose(logits, ref, atol=2e-2, rtol=2e-2), "batched mismatch vs JAX reference"

    # Single-embedding path (matches the PyTorch module's 1-D output).
    single = openai_text_model_forward(embeddings[0], prepared, tm=128)
    single = jax.block_until_ready(single)
    assert single.shape == (NUM_CLASSES,)
    assert jnp.allclose(single, ref[0], atol=2e-2, rtol=2e-2), "single mismatch vs JAX reference"

    print("KERNEL_OK")
</pallas_src>

<mosaic_0001>
module attributes {stable_mosaic.version = 11 : i64} {
  func.func @_mlp_kernel(%arg0: i32, %arg1: memref<128x768xbf16, #tpu.memory_space<vmem>>, %arg2: memref<768x128xbf16, #tpu.memory_space<vmem>>, %arg3: memref<128x128xbf16, #tpu.memory_space<vmem>>, %arg4: memref<128x128xbf16, #tpu.memory_space<vmem>>, %arg5: memref<128x128xbf16, #tpu.memory_space<vmem>>, %arg6: memref<8x128xf32, #tpu.memory_space<vmem>>, %arg7: memref<128x128xf32, #tpu.memory_space<vmem>>) attributes {dimension_semantics = [#tpu.dimension_semantics<parallel>], iteration_bounds = array<i64: 2>, scalar_prefetch = 0 : i64, scratch_operands = 0 : i64, tpu.core_type = #tpu.core_type<tc>, window_params = [{transform_indices = @transform_0, window_bounds = array<i64: 128, 768>}, {pipeline_mode = #tpu.pipeline_mode<synchronous>, transform_indices = @transform_1, window_bounds = array<i64: 768, 128>}, {pipeline_mode = #tpu.pipeline_mode<synchronous>, transform_indices = @transform_2, window_bounds = array<i64: 128, 128>}, {pipeline_mode = #tpu.pipeline_mode<synchronous>, transform_indices = @transform_3, window_bounds = array<i64: 128, 128>}, {pipeline_mode = #tpu.pipeline_mode<synchronous>, transform_indices = @transform_4, window_bounds = array<i64: 128, 128>}, {pipeline_mode = #tpu.pipeline_mode<synchronous>, transform_indices = @transform_5, window_bounds = array<i64: 8, 128>}, {transform_indices = @transform_6, window_bounds = array<i64: 128, 128>}]} {
    %c0 = arith.constant 0 : index
    %c0_0 = arith.constant 0 : index
    %0 = vector.load %arg6[%c0, %c0_0] : memref<8x128xf32, #tpu.memory_space<vmem>>, vector<1x128xf32>
    %c1 = arith.constant 1 : index
    %c0_1 = arith.constant 0 : index
    %1 = vector.load %arg6[%c1, %c0_1] : memref<8x128xf32, #tpu.memory_space<vmem>>, vector<1x128xf32>
    %c2 = arith.constant 2 : index
    %c0_2 = arith.constant 0 : index
    %2 = vector.load %arg6[%c2, %c0_2] : memref<8x128xf32, #tpu.memory_space<vmem>>, vector<1x128xf32>
    %c3 = arith.constant 3 : index
    %c0_3 = arith.constant 0 : index
    %3 = vector.load %arg6[%c3, %c0_3] : memref<8x128xf32, #tpu.memory_space<vmem>>, vector<1x128xf32>
    %c0_4 = arith.constant 0 : index
    %c0_5 = arith.constant 0 : index
    %4 = vector.load %arg1[%c0_4, %c0_5] : memref<128x768xbf16, #tpu.memory_space<vmem>>, vector<128x768xbf16>
    %c0_6 = arith.constant 0 : index
    %c0_7 = arith.constant 0 : index
    %5 = vector.load %arg2[%c0_6, %c0_7] : memref<768x128xbf16, #tpu.memory_space<vmem>>, vector<768x128xbf16>
    %cst = arith.constant dense<0.000000e+00> : vector<128x128xf32>
    %6 = tpu.matmul %4, %5, %cst {dimension_numbers = #tpu.dot_dimension_numbers<[1], [0], [0], [1], [0, 0, 1, 1], [], []>} : vector<128x768xbf16>, vector<768x128xbf16>, vector<128x128xf32> -> vector<128x128xf32>
    %7 = vector.broadcast %0 : vector<1x128xf32> to vector<128x128xf32>
    %8 = arith.addf %6, %7 : vector<128x128xf32>
    %cst_8 = arith.constant 0.000000e+00 : f32
    %9 = vector.broadcast %cst_8 : f32 to vector<128x128xf32>
    %10 = arith.maximumf %8, %9 : vector<128x128xf32>
    %11 = arith.truncf %10 : vector<128x128xf32> to vector<128x128xbf16>
    %c0_9 = arith.constant 0 : index
    %c0_10 = arith.constant 0 : index
    %12 = vector.load %arg3[%c0_9, %c0_10] : memref<128x128xbf16, #tpu.memory_space<vmem>>, vector<128x128xbf16>
    %cst_11 = arith.constant dense<0.000000e+00> : vector<128x128xf32>
    %13 = tpu.matmul %11, %12, %cst_11 {dimension_numbers = #tpu.dot_dimension_numbers<[1], [0], [0], [1], [0, 0, 1, 1], [], []>} : vector<128x128xbf16>, vector<128x128xbf16>, vector<128x128xf32> -> vector<128x128xf32>
    %14 = vector.broadcast %1 : vector<1x128xf32> to vector<128x128xf32>
    %15 = arith.addf %13, %14 : vector<128x128xf32>
    %cst_12 = arith.constant 0.000000e+00 : f32
    %16 = vector.broadcast %cst_12 : f32 to vector<128x128xf32>
    %17 = arith.maximumf %15, %16 : vector<128x128xf32>
    %18 = arith.truncf %17 : vector<128x128xf32> to vector<128x128xbf16>
    %c0_13 = arith.constant 0 : index
    %c0_14 = arith.constant 0 : index
    %19 = vector.load %arg4[%c0_13, %c0_14] : memref<128x128xbf16, #tpu.memory_space<vmem>>, vector<128x128xbf16>
    %cst_15 = arith.constant dense<0.000000e+00> : vector<128x128xf32>
    %20 = tpu.matmul %18, %19, %cst_15 {dimension_numbers = #tpu.dot_dimension_numbers<[1], [0], [0], [1], [0, 0, 1, 1], [], []>} : vector<128x128xbf16>, vector<128x128xbf16>, vector<128x128xf32> -> vector<128x128xf32>
    %21 = vector.broadcast %2 : vector<1x128xf32> to vector<128x128xf32>
    %22 = arith.addf %20, %21 : vector<128x128xf32>
    %cst_16 = arith.constant 0.000000e+00 : f32
    %23 = vector.broadcast %cst_16 : f32 to vector<128x128xf32>
    %24 = arith.maximumf %22, %23 : vector<128x128xf32>
    %25 = arith.truncf %24 : vector<128x128xf32> to vector<128x128xbf16>
    %c0_17 = arith.constant 0 : index
    %c0_18 = arith.constant 0 : index
    %26 = vector.load %arg5[%c0_17, %c0_18] : memref<128x128xbf16, #tpu.memory_space<vmem>>, vector<128x128xbf16>
    %cst_19 = arith.constant dense<0.000000e+00> : vector<128x128xf32>
    %27 = tpu.matmul %25, %26, %cst_19 {dimension_numbers = #tpu.dot_dimension_numbers<[1], [0], [0], [1], [0, 0, 1, 1], [], []>} : vector<128x128xbf16>, vector<128x128xbf16>, vector<128x128xf32> -> vector<128x128xf32>
    %28 = vector.broadcast %3 : vector<1x128xf32> to vector<128x128xf32>
    %29 = arith.addf %27, %28 : vector<128x128xf32>
    %c0_20 = arith.constant 0 : index
    %c0_21 = arith.constant 0 : index
    %30 = vector.load %arg7[%c0_20, %c0_21] : memref<128x128xf32, #tpu.memory_space<vmem>>, vector<128x128xf32>
    tpu.vector_store %arg7[%c0_20, %c0_21], %29 {strides = array<i32>} : memref<128x128xf32, #tpu.memory_space<vmem>>, vector<128x128xf32>,
    return
  }
  func.func @transform_0(%arg0: i32) -> (i32, i32) {
    %c0_i32 = arith.constant 0 : i32
    %c0_i32_0 = arith.constant 0 : i32
    return %arg0, %c0_i32 : i32, i32
  }
  func.func @transform_1(%arg0: i32) -> (i32, i32) {
    %c0_i32 = arith.constant 0 : i32
    %c0_i32_0 = arith.constant 0 : i32
    %c0_i32_1 = arith.constant 0 : i32
    return %c0_i32, %c0_i32_0 : i32, i32
  }
  func.func @transform_2(%arg0: i32) -> (i32, i32) {
    %c0_i32 = arith.constant 0 : i32
    %c0_i32_0 = arith.constant 0 : i32
    %c0_i32_1 = arith.constant 0 : i32
    return %c0_i32, %c0_i32_0 : i32, i32
  }
  func.func @transform_3(%arg0: i32) -> (i32, i32) {
    %c0_i32 = arith.constant 0 : i32
    %c0_i32_0 = arith.constant 0 : i32
    %c0_i32_1 = arith.constant 0 : i32
    return %c0_i32, %c0_i32_0 : i32, i32
  }
  func.func @transform_4(%arg0: i32) -> (i32, i32) {
    %c0_i32 = arith.constant 0 : i32
    %c0_i32_0 = arith.constant 0 : i32
    %c0_i32_1 = arith.constant 0 : i32
    return %c0_i32, %c0_i32_0 : i32, i32
  }
  func.func @transform_5(%arg0: i32) -> (i32, i32) {
    %c0_i32 = arith.constant 0 : i32
    %c0_i32_0 = arith.constant 0 : i32
    %c0_i32_1 = arith.constant 0 : i32
    return %c0_i32, %c0_i32_0 : i32, i32
  }
  func.func @transform_6(%arg0: i32) -> (i32, i32) {
    %c0_i32 = arith.constant 0 : i32
    %c0_i32_0 = arith.constant 0 : i32
    return %arg0, %c0_i32 : i32, i32
  }
}

</mosaic_0001>

<bundles_post_ra>
// kernel: _forward_impl.1
= control target key start
LH: loop header
LB: loop body
LE: loop exit
PB: predicated region body
PF: predicated region fallthrough
CT: control target
= control target key end

     0   :  { %s2552_s21 = smov 0   ;;  %s3025_s0 = inlined_call_operand.vmem [shape: bf16[256,768], index: 0, kind: input, shape index: {}]   ;;  %s3026_s1 = inlined_call_operand.vmem [shape: bf16[768,128], index: 1, kind: input, shape index: {}]   ;;  %s3027_s2 = inlined_call_operand.vmem [shape: bf16[128,128], index: 2, kind: input, shape index: {}]   ;;  %s3028_s3 = inlined_call_operand.vmem [shape: bf16[128,128], index: 3, kind: input, shape index: {}]   ;;  %s3029_s4 = inlined_call_operand.vmem [shape: bf16[128,128], index: 4, kind: input, shape index: {}]   ;;  %s3030_s5 = inlined_call_operand.vmem [shape: f32[8,128], index: 5, kind: input, shape index: {}]   ;;  %s3031_s6 = inlined_call_operand.vmem [shape: f32[256,128], index: 6, kind: output, shape index: {}]  }
   0x1 LB: > { %s1869_s22 = sadd.s32 4294967295, %s2515_s21   ;;  %p1873_p0 = scmp.ge.s32.totalorder %s2515_s21, 1  ;;  %s2515_s21 = sphi %s2552_s21, %s16_s21  }
   0x2   : > { %p214_p1 = scmp.lt.s32.totalorder %s2515_s21, 3 }
   0x4   : > { %p215_p2 = pnand %p1873_p0, %p214_p1 }
   0x5   : > { %s1874_s29 = sshll.u32 (!%p215_p2), %s1869_s22, 4 }
   0x6   : > { %218 = sbr.rel (%p215_p2) target bundleno = 985 (0x3d9), region = 44  ;;  %p246_p3 = scmp.lt.s32.totalorder (!%p215_p2), %s1874_s29, 31 }
   0xb   : > { %v2365_v0 = vld [vmem:[%s3026_s1 + $0x78] sm:$0xff]   ;;  %v2369_v4 = vld [vmem:[%s3026_s1 + $0x70] sm:$0xff]   ;;  %v2373_v8 = vld [vmem:[%s3026_s1 + $0x68] sm:$0xff]   ;;  %s3033_s29 = smov (!%p246_p3, %s1874_s29), 31 }
   0xc   : > { %v2366_v1 = vld [vmem:[%s3026_s1 + $0x38] sm:$0xff]   ;;  %2004 = vmatprep.subr.bf16.mxu0 %v2365_v0  ;;  %v2370_v5 = vld [vmem:[%s3026_s1 + $0x30] sm:$0xff]   ;;  %v2374_v9 = vld [vmem:[%s3026_s1 + $0x28] sm:$0xff]   ;;  %s2356_s30 = smul.u32 24, %s3033_s29  ;;  %s1877_s24 = sshll.u32 %s3033_s29, 3 }
   0xd   : > { %v2367_v2 = vld [vmem:[%s3026_s1 + $0xf8] sm:$0xff]   ;;  %2005 = vmatpush3.bf16.msra.mxu0 %v2366_v1  ;;  %v2371_v6 = vld [vmem:[%s3026_s1 + $0xf0] sm:$0xff]   ;;  %v2375_v10 = vld [vmem:[%s3026_s1 + $0xe8] sm:$0xff]  }
   0xe   : > { %v2368_v3 = vld [vmem:[%s3026_s1 + $0xb8] sm:$0xff]   ;;  %2068 = vmatprep.subr.bf16.mxu1 %v2367_v2  ;;  %2006 = vmatprep.subr.bf16.mxu0 %v2369_v4  ;;  %v2372_v7 = vld [vmem:[%s3026_s1 + $0xb0] sm:$0xff]   ;;  %v2376_v11 = vld [vmem:[%s3026_s1 + $0xa8] sm:$0xff]   ;;  %s2655_s16 = scalar_lea.vmem %s3025_s0, %s2356_s30  ;;  %s3004_s30 = scalar_lea.vmem %s3031_s6, %s1877_s24 }
   0xf   : > { %2069 = vmatpush3.bf16.msra.mxu1 %v2368_v3  ;;  %v2377_v12 = vld [vmem:[%s3026_s1 + $0x60] sm:$0xff]   ;;  %v2381_v16 = vld [vmem:[%s3026_s1 + $0x58] sm:$0xff]   ;;  %v2385_v20 = vld [vmem:[%s3026_s1 + $0x50] sm:$0xff]  }
  0x10   : > { %2070 = vmatprep.subr.bf16.mxu1 %v2371_v6  ;;  %v2378_v13 = vld [vmem:[%s3026_s1 + $0x20] sm:$0xff]   ;;  %v2382_v17 = vld [vmem:[%s3026_s1 + $0x18] sm:$0xff]   ;;  %v2386_v21 = vld [vmem:[%s3026_s1 + $0x10] sm:$0xff]  }
  0x11   : > { %2007 = vmatpush3.bf16.msra.mxu0 %v2370_v5  ;;  %v2379_v14 = vld [vmem:[%s3026_s1 + $0xe0] sm:$0xff]   ;;  %v2383_v18 = vld [vmem:[%s3026_s1 + $0xd8] sm:$0xff]   ;;  %v2387_v22 = vld [vmem:[%s3026_s1 + $0xd0] sm:$0xff]  }
  0x12   : > { %2008 = vmatprep.subr.bf16.mxu0 %v2373_v8  ;;  %v2380_v15 = vld [vmem:[%s3026_s1 + $0xa0] sm:$0xff]   ;;  %v2384_v19 = vld [vmem:[%s3026_s1 + $0x98] sm:$0xff]   ;;  %v2388_v23 = vld [vmem:[%s3026_s1 + $0x90] sm:$0xff]  }
  0x13   : > { %2071 = vmatpush3.bf16.msra.mxu1 %v2372_v7  ;;  %v2389_v24 = vld [vmem:[%s3026_s1 + $0x48] sm:$0xff]   ;;  %v2393_v28 = vld [vmem:[%s3026_s1 + $0x40] sm:$0xff]   ;;  %v2400_v34 = vld [vmem:[%s3026_s1 + $0x178] sm:$0xff]  }
  0x14   : > { %2072 = vmatprep.subr.bf16.mxu1 %v2375_v10  ;;  %v2390_v25 = vld [vmem:[%s3026_s1 + $0x8] sm:$0xff]   ;;  %v2394_v29 = vld [vmem:[%s3026_s1] sm:$0xff]   ;;  %v2404_v37 = vld [vmem:[%s3026_s1 + $0x138] sm:$0xff]  }
  0x15   : > { %2009 = vmatpush3.bf16.msra.mxu0 %v2374_v9  ;;  %v2391_v26 = vld [vmem:[%s3026_s1 + $0xc8] sm:$0xff]   ;;  %v2395_v30 = vld [vmem:[%s3026_s1 + $0xc0] sm:$0xff]   ;;  %v2408_v40 = vld [vmem:[%s3026_s1 + $0x170] sm:$0xff]  }
  0x16   : > { %2010 = vmatprep.subr.bf16.mxu0 %v2377_v12  ;;  %v2392_v27 = vld [vmem:[%s3026_s1 + $0x88] sm:$0xff]   ;;  %v2396_v31 = vld [vmem:[%s2655_s16] ss:$24 sps:$4 sm:$0xff]   ;;  %v2398_v32 = vld [vmem:[%s2655_s16 + $0x4] ss:$24 sps:$4 sm:$0xff]  }
  0x17   : > { %2073 = vmatpush3.bf16.msra.mxu1 %v2376_v11  ;;  %v2399_v33 = vld [vmem:[%s3026_s1 + $0x80] sm:$0xff]   ;;  %971 = vmatprep.mubr.bf16.mxu0 %v2398_v32  ;;  %v2405_v38 = vld [vmem:[%s2655_s16 + $0x34] ss:$24 sps:$4 sm:$0xff]   ;;  %v2407_v39 = vld [vmem:[%s2655_s16 + $0x30] ss:$24 sps:$4 sm:$0xff]  }
  0x18   : > { %2074 = vmatprep.subr.bf16.mxu1 %v2379_v14  ;;  %v2401_v35 = vld [vmem:[%s2655_s16 + $0x8] ss:$24 sps:$4 sm:$0xff]   ;;  %v2403_v36 = vld [vmem:[%s2655_s16 + $0xc] ss:$24 sps:$4 sm:$0xff]   ;;  %v2409_v41 = vld [vmem:[%s2655_s16 + $0x3c] ss:$24 sps:$4 sm:$0xff]  }
  0x19   : > { %2011 = vmatpush3.bf16.msra.mxu0 %v2378_v13  ;;  %1068 = vmatprep.mubr.bf16.mxu1 %v2403_v36  ;;  %v2411_v42 = vld [vmem:[%s3026_s1 + $0x130] sm:$0xff]   ;;  %v2413_v44 = vld [vmem:[%s2655_s16 + $0x64] ss:$24 sps:$4 sm:$0xff]   ;;  %v2416_v45 = vld [vmem:[%s3026_s1 + $0x168] sm:$0xff]  }
  0x1a   : > { %2012 = vmatprep.subr.bf16.mxu0 %v2381_v16  ;;  %v2412_v43 = vld [vmem:[%s2655_s16 + $0x38] ss:$24 sps:$4 sm:$0xff]   ;;  %v2417_v46 = vld [vmem:[%s2655_s16 + $0x6c] ss:$24 sps:$4 sm:$0xff]   ;;  %v2420_v51 = vld [vmem:[%s2655_s16 + $0x68] ss:$24 sps:$4 sm:$0xff]  }
  0x1b   : > { %2075 = vmatpush3.bf16.msra.mxu1 %v2380_v15  ;;  %v2419_v47 = vld [vmem:[%s3026_s1 + $0x128] sm:$0xff]   ;;  %v2415_v48 = vld [vmem:[%s2655_s16 + $0x60] ss:$24 sps:$4 sm:$0xff]   ;;  %v2425_v53 = vld [vmem:[%s2655_s16 + $0x9c] ss:$24 sps:$4 sm:$0xff]  }
  0x1c   : > { %2076 = vmatprep.subr.bf16.mxu1 %v2383_v18  ;;  %v2421_v49 = vld [vmem:[%s2655_s16 + $0x94] ss:$24 sps:$4 sm:$0xff]   ;;  %v2424_v50 = vld [vmem:[%s3026_s1 + $0x160] sm:$0xff]   ;;  %v2432_v54 = vld [vmem:[%s3026_s1 + $0x158] sm:$0xff]  }
  0x1d   : > { %2013 = vmatpush3.bf16.msra.mxu0 %v2382_v17  ;;  %v2427_v52 = vld [vmem:[%s3026_s1 + $0x120] sm:$0xff]   ;;  %v2435_v55 = vld [vmem:[%s3026_s1 + $0x118] sm:$0xff]   ;;  %v2423_v56 = vld [vmem:[%s2655_s16 + $0x90] ss:$24 sps:$4 sm:$0xff]  }
  0x1e   : > { %2014 = vmatprep.subr.bf16.mxu0 %v2385_v20  ;;  %v2429_v57 = vld [vmem:[%s2655_s16 + $0xc4] ss:$24 sps:$4 sm:$0xff]   ;;  %v2440_v58 = vld [vmem:[%s3026_s1 + $0x150] sm:$0xff]   ;;  %v2448_v62 = vld [vmem:[%s3026_s1 + $0x148] sm:$0xff]  }
  0x1f   : > { %2077 = vmatpush3.bf16.msra.mxu1 %v2384_v19  ;;  %v2428_v59 = vld [vmem:[%s2655_s16 + $0x98] ss:$24 sps:$4 sm:$0xff]   ;;  %v2433_v60 = vld [vmem:[%s2655_s16 + $0xcc] ss:$24 sps:$4 sm:$0xff]   ;;  %v2436_v2 = vld [vmem:[%s2655_s16 + $0xc8] ss:$24 sps:$4 sm:$0xff]  }
  0x20   : > { %2078 = vmatprep.subr.bf16.mxu1 %v2387_v22  ;;  %v2443_v61 = vld [vmem:[%s3026_s1 + $0x110] sm:$0xff]   ;;  %v2431_v63 = vld [vmem:[%s2655_s16 + $0xc0] ss:$24 sps:$4 sm:$0xff]   ;;  %v2451_v1 = vld [vmem:[%s3026_s1 + $0x108] sm:$0xff]  }
  0x21   : > { %2015 = vmatpush3.bf16.msra.mxu0 %v2386_v21  ;;  %v2437_v0 = vld [vmem:[%s2655_s16 + $0xf4] ss:$24 sps:$4 sm:$0xff]   ;;  %v2456_v3 = vld [vmem:[%s3026_s1 + $0x140] sm:$0xff]   ;;  %v2439_v6 = vld [vmem:[%s2655_s16 + $0xf0] ss:$24 sps:$4 sm:$0xff]  }
  0x22   : > { %2016 = vmatprep.subr.bf16.mxu0 %v2389_v24  ;;  %v2441_v4 = vld [vmem:[%s2655_s16 + $0xfc] ss:$24 sps:$4 sm:$0xff]   ;;  %v2459_v5 = vld [vmem:[%s3026_s1 + $0x100] sm:$0xff]   ;;  %v2444_v8 = vld [vmem:[%s2655_s16 + $0xf8] ss:$24 sps:$4 sm:$0xff]  }
  0x23   : > { %2079 = vmatpush3.bf16.msra.mxu1 %v2388_v23  ;;  %v2445_v7 = vld [vmem:[%s2655_s16 + $0x124] ss:$24 sps:$4 sm:$0xff]   ;;  %v2447_v10 = vld [vmem:[%s2655_s16 + $0x120] ss:$24 sps:$4 sm:$0xff]   ;;  %v2453_v11 = vld [vmem:[%s2655_s16 + $0x154] ss:$24 sps:$4 sm:$0xff]  }
  0x24   : > { %2080 = vmatprep.subr.bf16.mxu1 %v2391_v26  ;;  %v2449_v9 = vld [vmem:[%s2655_s16 + $0x12c] ss:$24 sps:$4 sm:$0xff]   ;;  %v2452_v12 = vld [vmem:[%s2655_s16 + $0x128] ss:$24 sps:$4 sm:$0xff]   ;;  %v2457_v13 = vld [vmem:[%s2655_s16 + $0x15c] ss:$24 sps:$4 sm:$0xff]  }
  0x25   : > { %2017 = vmatpush3.bf16.msra.mxu0 %v2390_v25  ;;  %v2455_v14 = vld [vmem:[%s2655_s16 + $0x150] ss:$24 sps:$4 sm:$0xff]   ;;  %v2463_v15 = vld [vmem:[%s2655_s16 + $0x14] ss:$24 sps:$4 sm:$0xff]   ;;  %v2464_v18 = vld [vmem:[%s2655_s16 + $0x44] ss:$24 sps:$4 sm:$0xff]  }
  0x26   : > { %2018 = vmatprep.subr.bf16.mxu0 %v2393_v28  ;;  %v2460_v16 = vld [vmem:[%s2655_s16 + $0x158] ss:$24 sps:$4 sm:$0xff]   ;;  %v2467_v20 = vld [vmem:[%s2655_s16 + $0x74] ss:$24 sps:$4 sm:$0xff]   ;;  %v2470_v22 = vld [vmem:[%s2655_s16 + $0xa4] ss:$24 sps:$4 sm:$0xff]  }
  0x27   : > { %2081 = vmatpush3.bf16.msra.mxu1 %v2392_v27  ;;  %v2461_v17 = vld [vmem:[%s2655_s16 + $0x10] ss:$24 sps:$4 sm:$0xff]   ;;  %v2466_v19 = vld [vmem:[%s2655_s16 + $0x40] ss:$24 sps:$4 sm:$0xff]   ;;  %v2473_v24 = vld [vmem:[%s2655_s16 + $0xd4] ss:$24 sps:$4 sm:$0xff]  }
  0x28   : > { %2082 = vmatprep.subr.bf16.mxu1 %v2395_v30  ;;  %v2469_v21 = vld [vmem:[%s2655_s16 + $0x70] ss:$24 sps:$4 sm:$0xff]   ;;  %v2472_v23 = vld [vmem:[%s2655_s16 + $0xa0] ss:$24 sps:$4 sm:$0xff]   ;;  %v2476_v26 = vld [vmem:[%s2655_s16 + $0x104] ss:$24 sps:$4 sm:$0xff]  }
  0x29   : > { %2019 = vmatpush3.bf16.msra.mxu0 %v2394_v29  ;;  %v2475_v25 = vld [vmem:[%s2655_s16 + $0xd0] ss:$24 sps:$4 sm:$0xff]   ;;  %v2478_v27 = vld [vmem:[%s2655_s16 + $0x100] ss:$24 sps:$4 sm:$0xff]   ;;  %v2479_v28 = vld [vmem:[%s2655_s16 + $0x134] ss:$24 sps:$4 sm:$0xff]  }
  0x2a   : > { %2132 = vmatprep.subr.bf16.mxu0 %v2400_v34  ;;  %v2481_v29 = vld [vmem:[%s2655_s16 + $0x130] ss:$24 sps:$4 sm:$0xff]   ;;  %v2482_v30 = vld [vmem:[%s2655_s16 + $0x164] ss:$24 sps:$4 sm:$0xff]   ;;  %v2484_v32 = vld [vmem:[%s2655_s16 + $0x160] ss:$24 sps:$4 sm:$0xff]  }
  0x2b   : > { %2083 = vmatpush3.bf16.msra.mxu1 %v2399_v33  ;;  %v2486_v33 = vld [vmem:[%s3027_s2 + $0x30] sm:$0xff]   ;;  %v2487_v34 = vld [vmem:[%s3027_s2 + $0x28] sm:$0xff]   ;;  %v2489_v36 = vld [vmem:[%s3027_s2 + $0x18] sm:$0xff]  }
  0x2c   : > { %972 = vmatmul.mubr.bf16.vlgmr.msra.gmra.mxu0 %v2396_v31  ;;  %v2485_v31 = vld [vmem:[%s3027_s2 + $0x38] sm:$0xff]  }
  0x2d   : > { %2133 = vmatpush3.bf16.msra.mxu0 %v2404_v37  ;;  %979 = vmatprep.mubr.bf16.mxu0 %v2405_v38  ;;  %v2490_v37 = vld [vmem:[%s3027_s2 + $0x10] sm:$0xff]   ;;  %v2491_v38 = vld [vmem:[%s3027_s2 + $0x8] sm:$0xff]  }
  0x2e   : > { %1069 = vmatmul.mubr.bf16.vlgmr.msra.gmra.mxu1 %v2401_v35  ;;  %2134 = vmatprep.subr.bf16.mxu0 %v2408_v40  ;;  %v2488_v35 = vld [vmem:[%s3027_s2 + $0x20] sm:$0xff]  }
  0x2f   : > { %1076 = vmatprep.mubr.bf16.mxu1 %v2409_v41  ;;  %2244 = vmatprep.subr.bf16.mxu1 %v2485_v31 }
  0x30   : > { %2245 = vmatpush3.bf16.msra.mxu1 %v2485_v31 }
  0x31   : > { %2135 = vmatpush3.bf16.msra.mxu0 %v2411_v42  ;;  %2246 = vmatprep.subr.bf16.mxu1 %v2486_v33 }
  0x32   : > { %2136 = vmatprep.subr.bf16.mxu0 %v2416_v45 }
  0x34   : > { %980 = vmatmul.mubr.bf16.gmra.mxu0 %v2407_v39  ;;  %2247 = vmatpush3.bf16.msra.mxu1 %v2486_v33  ;;  %v2492_v39 = vld [vmem:[%s3027_s2] sm:$0xff]  }
  0x35   : > { %987 = vmatprep.mubr.bf16.mxu0 %v2413_v44  ;;  %2137 = vmatpush3.bf16.msra.mxu0 %v2419_v47  ;;  %v2855_v33 = vld [vmem:[%s3030_s5] ss:$0 sm:$0xff] }
  0x36   : > { %1077 = vmatmul.mubr.bf16.gmra.mxu1 %v2412_v43  ;;  %2138 = vmatprep.subr.bf16.mxu0 %v2424_v50 }
  0x37   : > { %1084 = vmatprep.mubr.bf16.mxu1 %v2417_v46  ;;  %2248 = vmatprep.subr.bf16.mxu1 %v2487_v34 }
  0x38   : > { %2249 = vmatpush3.bf16.msra.mxu1 %v2487_v34 }
  0x39   : > { %2139 = vmatpush3.bf16.msra.mxu0 %v2427_v52  ;;  %2250 = vmatprep.subr.bf16.mxu1 %v2488_v35 }
  0x3a   : > { %2140 = vmatprep.subr.bf16.mxu0 %v2432_v54 }
  0x3c   : > { %988 = vmatmul.mubr.bf16.gmra.mxu0 %v2415_v48  ;;  %2251 = vmatpush3.bf16.msra.mxu1 %v2488_v35  ;;  %v2789_v48 = vld [vmem:[%s3028_s3 + $0x38] sm:$0xff]  }
  0x3d   : > { %995 = vmatprep.mubr.bf16.mxu0 %v2421_v49  ;;  %2141 = vmatpush3.bf16.msra.mxu0 %v2435_v55 }
  0x3e   : > { %1085 = vmatmul.mubr.bf16.gmra.mxu1 %v2420_v51  ;;  %2142 = vmatprep.subr.bf16.mxu0 %v2440_v58 }
  0x3f   : > { %1092 = vmatprep.mubr.bf16.mxu1 %v2425_v53  ;;  %2252 = vmatprep.subr.bf16.mxu1 %v2489_v36 }
  0x40   : > { %2253 = vmatpush3.bf16.msra.mxu1 %v2489_v36 }
  0x41   : > { %2143 = vmatpush3.bf16.msra.mxu0 %v2443_v61  ;;  %2254 = vmatprep.subr.bf16.mxu1 %v2490_v37 }
  0x42   : > { %2144 = vmatprep.subr.bf16.mxu0 %v2448_v62 }
  0x44   : > { %996 = vmatmul.mubr.bf16.gmra.mxu0 %v2423_v56  ;;  %2255 = vmatpush3.bf16.msra.mxu1 %v2490_v37 }
  0x45   : > { %1003 = vmatprep.mubr.bf16.mxu0 %v2429_v57  ;;  %2145 = vmatpush3.bf16.msra.mxu0 %v2451_v1 }
  0x46   : > { %1093 = vmatmul.mubr.bf16.gmra.mxu1 %v2428_v59  ;;  %2146 = vmatprep.subr.bf16.mxu0 %v2456_v3 }
  0x47   : > { %1100 = vmatprep.mubr.bf16.mxu1 %v2433_v60  ;;  %2256 = vmatprep.subr.bf16.mxu1 %v2491_v38 }
  0x48   : > { %2257 = vmatpush3.bf16.msra.mxu1 %v2491_v38 }
  0x49   : > { %2147 = vmatpush3.bf16.msra.mxu0 %v2459_v5  ;;  %2258 = vmatprep.subr.bf16.mxu1 %v2492_v39 }
  0x4c   : > { %1004 = vmatmul.mubr.bf16.gmra.mxu0 %v2431_v63  ;;  %2259 = vmatpush3.bf16.msra.mxu1 %v2492_v39 }
  0x4d   : > { %1011 = vmatprep.mubr.bf16.mxu0 %v2437_v0  ;;  %2276 = vmatprep.subr.bf16.mxu1 %v2789_v48 }
  0x4e   : > { %1101 = vmatmul.mubr.bf16.gmra.mxu1 %v2436_v2 }
  0x4f   : > { %1108 = vmatprep.mubr.bf16.mxu1 %v2441_v4 }
  0x54   : > { %1012 = vmatmul.mubr.bf16.gmra.mxu0 %v2439_v6 }
  0x55   : > { %1019 = vmatprep.mubr.bf16.mxu0 %v2445_v7 }
  0x56   : > { %1109 = vmatmul.mubr.bf16.gmra.mxu1 %v2444_v8 }
  0x57   : > { %1116 = vmatprep.mubr.bf16.mxu1 %v2449_v9 }
  0x5c   : > { %1020 = vmatmul.mubr.bf16.gmra.mxu0 %v2447_v10 }
  0x5d   : > { %1027 = vmatprep.mubr.bf16.mxu0 %v2453_v11 }
  0x5e   : > { %1117 = vmatmul.mubr.bf16.gmra.mxu1 %v2452_v12 }
  0x5f   : > { %1124 = vmatprep.mubr.bf16.mxu1 %v2457_v13 }
  0x64   : > { %1028 = vmatmul.mubr.bf16.gmra.mxu0 %v2455_v14 }
  0x65   : > { %1165 = vmatprep.mubr.bf16.mxu0 %v2463_v15 }
  0x66   : > { %1125 = vmatmul.mubr.bf16.gmra.mxu1 %v2460_v16 }
  0x6c   : > { %1166 = vmatmul.mubr.bf16.vlgmr.msra.gmra.mxu0 %v2461_v17 }
  0x6d   : > { %1173 = vmatprep.mubr.bf16.mxu0 %v2464_v18 }
  0x74   : > { %1174 = vmatmul.mubr.bf16.gmra.mxu0 %v2466_v19 }
  0x75   : > { %1181 = vmatprep.mubr.bf16.mxu0 %v2467_v20 }
  0x7c   : > { %1182 = vmatmul.mubr.bf16.gmra.mxu0 %v2469_v21 }
  0x7d   : > { %1189 = vmatprep.mubr.bf16.mxu0 %v2470_v22 }
  0x84   : > { %1190 = vmatmul.mubr.bf16.gmra.mxu0 %v2472_v23 }
  0x85   : > { %1197 = vmatprep.mubr.bf16.mxu0 %v2473_v24 }
  0x8c   : > { %1198 = vmatmul.mubr.bf16.gmra.mxu0 %v2475_v25 }
  0x8d   : > { %1205 = vmatprep.mubr.bf16.mxu0 %v2476_v26 }
  0x94   : > { %1206 = vmatmul.mubr.bf16.gmra.mxu0 %v2478_v27 }
  0x95   : > { %1213 = vmatprep.mubr.bf16.mxu0 %v2479_v28 }
  0x9c   : > { %1214 = vmatmul.mubr.bf16.gmra.mxu0 %v2481_v29 }
  0x9d   : > { %1221 = vmatprep.mubr.bf16.mxu0 %v2482_v30 }
  0xa4   : > { %1222 = vmatmul.mubr.bf16.gmra.mxu0 %v2484_v32 }
  0xec   : > { %v2020_v40 = vpop.f32.mrf.mxu0 }
  0xee   : > { %v2021_v41 = vpop.f32.mrf.mxu0  ;;  %v2084_v43 = vpop.f32.mrf.mxu1 }
  0xef   : > { %v2022_v42 = vadd.f32 %v2021_v41, %v2020_v40 }
  0xf0   : > { %v2023_v44 = vpop.f32.mrf.mxu0  ;;  %v2085_v45 = vpop.f32.mrf.mxu1 }
  0xf1   : > { %v974_v38 = vadd.f32 %v2022_v42, %v2855_v33  ;;  %v2086_v39 = vadd.f32 %v2085_v45, %v2084_v43 }
  0xf2   : > { %v2024_v46 = vpop.f32.mrf.mxu0  ;;  %v2087_v47 = vpop.f32.mrf.mxu1 }
  0xf3   : > { %v2025_v35 = vadd.f32 %v2024_v46, %v2023_v44 }
  0xf4   : > { %v2026_v49 = vpop.f32.mrf.mxu0  ;;  %v2088_v50 = vpop.f32.mrf.mxu1 }
  0xf5   : > { %v977_v41 = vadd.f32 %v2025_v35, %v2855_v33 }
  0xf6   : > { %v2027_v51 = vpop.f32.mrf.mxu0  ;;  %v2794_v53 = vpop.f32.mrf.mxu1 }
  0xf7   : > { %v2792_v52 = vadd.f32 %v2027_v51, %v2026_v49  ;;  %v2089_v49 = vadd.f32 %v2088_v50, %v2087_v47 }
  0xf8   : > { %v2029_v54 = vpop.f32.mrf.mxu0  ;;  %v2796_v56 = vpop.f32.mrf.mxu1 }
  0xf9   : > { %v982_v42 = vadd.f32 %v2792_v52, %v2855_v33  ;;  %v2092_v43 = vadd.f32 %v2796_v56, %v2794_v53 }
  0xfa   : > { %v2030_v55 = vpop.f32.mrf.mxu0  ;;  %v2800_v60 = vpop.f32.mrf.mxu1 }
  0xfb   : > { %v1079_v35 = vadd.f32 %v2092_v43, %v982_v42 }
  0xfc   : > { %v2032_v57 = vpop.f32.mrf.mxu0  ;;  %v2094_v63 = vpop.f32.mrf.mxu1 }
  0xfe   : > { %v2033_v58 = vpop.f32.mrf.mxu0  ;;  %v2808_v3 = vpop.f32.mrf.mxu1 }
  0xff   : > { %v2798_v59 = vadd.f32 %v2033_v58, %v2032_v57 }
 0x100   : > { %v2802_v61 = vpop.f32.mrf.mxu0  ;;  %v2814_v6 = vpop.f32.mrf.mxu1 }
 0x102   : > { %v2804_v62 = vpop.f32.mrf.mxu0  ;;  %v2818_v10 = vpop.f32.mrf.mxu1 }
 0x103   : > { %v2037_v52 = vadd.f32 %v2804_v62, %v2802_v61 }
 0x104   : > { %v2038_v0 = vpop.f32.mrf.mxu0  ;;  %v2824_v13 = vpop.f32.mrf.mxu1 }
 0x105   : > { %v2101_v61 = vadd.f32 %v2824_v13, %v2818_v10 }
 0x106   : > { %v2039_v1 = vpop.f32.mrf.mxu0  ;;  %v2828_v17 = vpop.f32.mrf.mxu1 }
 0x107   : > { %v2806_v2 = vadd.f32 %v2039_v1, %v2038_v0  ;;  %v1071_v0 = vadd.f32 %v2086_v39, %v974_v38  ;;  %v2031_v1 = vadd.f32 %v2030_v55, %v2029_v54 }
 0x108   : > { %v2810_v4 = vpop.f32.mrf.mxu0  ;;  %v2834_v20 = vpop.f32.mrf.mxu1 }
 0x109   : > { %v985_v47 = vadd.f32 %v2031_v1, %v2855_v33 }
 0x10a   : > { %v2812_v5 = vpop.f32.mrf.mxu0  ;;  %v2838_v24 = vpop.f32.mrf.mxu1 }
 0x10c   : > { %v2044_v7 = vpop.f32.mrf.mxu0  ;;  %v2844_v27 = vpop.f32.mrf.mxu1 }
 0x10e   : > { %v2045_v8 = vpop.f32.mrf.mxu0  ;;  %v2848_v31 = vpop.f32.mrf.mxu1 }
 0x10f   : > { %v2816_v9 = vadd.f32 %v2045_v8, %v2044_v7  ;;  %v1074_v8 = vadd.f32 %v2089_v49, %v977_v41 }
 0x110   : > { %v2820_v11 = vpop.f32.mrf.mxu0  ;;  %v2859_v36 = vpop.f32.mrf.mxu1 }
 0x112   : > { %v2822_v12 = vpop.f32.mrf.mxu0  ;;  %v2863_v57 = vpop.f32.mrf.mxu1 }
 0x114   : > { %v2050_v14 = vpop.f32.mrf.mxu0  ;;  %v2865_v46 = vpop.f32.mrf.mxu1 }
 0x116   : > { %v2051_v15 = vpop.f32.mrf.mxu0 }
 0x117   : > { %v2826_v16 = vadd.f32 %v2051_v15, %v2050_v14 }
 0x118   : > { %v2830_v18 = vpop.f32.mrf.mxu0 }
 0x11a   : > { %v2832_v19 = vpop.f32.mrf.mxu0 }
 0x11c   : > { %v2056_v21 = vpop.f32.mrf.mxu0 }
 0x11e   : > { %v2057_v22 = vpop.f32.mrf.mxu0 }
 0x11f   : > { %v2836_v23 = vadd.f32 %v2057_v22, %v2056_v21  ;;  %v2095_v21 = vadd.f32 %v2094_v63, %v2800_v60  ;;  %v990_v60 = vadd.f32 %v2798_v59, %v2855_v33  ;;  %v2098_v63 = vadd.f32 %v2814_v6, %v2808_v3  ;;  %v2494_v59 = vld [vmem:[%s3028_s3 + $0x30] sm:$0xff]  }
 0x120   : > { %v2840_v25 = vpop.f32.mrf.mxu0  ;;  %v2043_v3 = vadd.f32 %v2812_v5, %v2810_v4  ;;  %v2495_v4 = vld [vmem:[%s3028_s3 + $0x28] sm:$0xff]  }
 0x121   : > { %v1082_v39 = vadd.f32 %v2095_v21, %v985_v47  ;;  %v2104_v47 = vadd.f32 %v2834_v20, %v2828_v17 }
 0x122   : > { %v2842_v26 = vpop.f32.mrf.mxu0  ;;  %v1001_v5 = vadd.f32 %v2043_v3, %v2855_v33 }
 0x124   : > { %v2062_v28 = vpop.f32.mrf.mxu0 }
 0x126   : > { %v2063_v29 = vpop.f32.mrf.mxu0 }
 0x127   : > { %v2846_v30 = vadd.f32 %v2063_v29, %v2062_v28  ;;  %v2873_v28 = vpop.f32.mrf.mxu1 }
 0x128   : > { %v2850_v32 = vpop.f32.mrf.mxu0 }
 0x12a   : > { %v2857_v34 = vpop.f32.mrf.mxu0 }
 0x12c   : > { %v2148_v37 = vpop.f32.mrf.mxu0 }
 0x12e   : > { %v2149_v40 = vpop.f32.mrf.mxu0 }
 0x12f   : > { %v2150_v51 = vadd.f32 %v2149_v40, %v2148_v37  ;;  %v2877_v40 = vpop.f32.mrf.mxu1 }
 0x130   : > { %v2151_v58 = vpop.f32.mrf.mxu0 }
 0x131   : > { %v1168_v14 = vadd.f32 %v2150_v51, %v1071_v0  ;;  %v993_v51 = vadd.f32 %v2037_v52, %v2855_v33 }
 0x132   : > { %v2152_v7 = vpop.f32.mrf.mxu0 }
 0x133   : > { %v2153_v44 = vadd.f32 %v2152_v7, %v2151_v58  ;;  %v1230_v54 = vmax.f32 %v1168_v14, 0.0  ;;  %v2886_v7 = vpop.f32.mrf.mxu1  ;;  %v1087_v14 = vadd.f32 %v2098_v63, %v990_v60 }
 0x134   : > { %v2154_v15 = vpop.f32.mrf.mxu0 }
 0x135   : > { %v1171_v45 = vadd.f32 %v2153_v44, %v1074_v8  ;;  %v2118_v10 = vpop.f32.mrf.mxu1 }
 0x136   : > { %v2155_v50 = vpop.f32.mrf.mxu0 }
 0x137   : > { %v1231_v55 = vmax.f32 %v1171_v45, 0.0  ;;  %v2156_v22 = vadd.f32 %v2155_v50, %v2154_v15  ;;  %v1090_v15 = vadd.f32 %v2101_v61, %v993_v51  ;;  %v998_v45 = vadd.f32 %v2806_v2, %v2855_v33 }
 0x138   : > { %v2157_v29 = vpop.f32.mrf.mxu0 }
 0x139   : > { %v1246_v37 = vpack.c.bf16 %v1231_v55, %v1230_v54  ;;  %v1176_v53 = vadd.f32 %v2156_v22, %v1079_v35  ;;  %v2107_v54 = vadd.f32 %v2844_v27, %v2838_v24  ;;  %v1095_v17 = vadd.f32 %v2104_v47, %v998_v45  ;;  %v2496_v35 = vld [vmem:[%s3028_s3 + $0x20] sm:$0xff]  }
 0x13a   : > { %v2158_v38 = vpop.f32.mrf.mxu0 }
 0x13b   : > { %v2159_v56 = vadd.f32 %v2158_v38, %v2157_v29  ;;  %2260 = vmatprep.mubr.bf16.mxu1 %v1246_v37  ;;  %v1232_v62 = vmax.f32 %v1176_v53, 0.0  ;;  %v2904_v29 = vpop.f32.mrf.mxu1  ;;  %v2049_v37 = vadd.f32 %v2822_v12, %v2820_v11  ;;  %v1098_v38 = vadd.f32 %v2107_v54, %v1001_v5  ;;  %v2497_v11 = vld [vmem:[%s3028_s3 + $0x18] sm:$0xff]  }
 0x13c   : > { %v2160_v41 = vpop.f32.mrf.mxu0  ;;  %v2061_v5 = vadd.f32 %v2842_v26, %v2840_v25 }
 0x13d   : > { %v1179_v49 = vadd.f32 %v2159_v56, %v1082_v39  ;;  %v2121_v39 = vpop.f32.mrf.mxu1  ;;  %v1006_v56 = vadd.f32 %v2816_v9, %v2855_v33  ;;  %v1009_v12 = vadd.f32 %v2049_v37, %v2855_v33 }
 0x13e   : > { %v2161_v58 = vpop.f32.mrf.mxu0 }
 0x13f   : > { %v1233_v0 = vmax.f32 %v1179_v49, 0.0  ;;  %v2162_v1 = vadd.f32 %v2161_v58, %v2160_v41  ;;  %v2110_v41 = vadd.f32 %v2859_v36, %v2848_v31  ;;  %v2113_v49 = vadd.f32 %v2865_v46, %v2863_v57 }
 0x140   : > { %v2163_v8 = vpop.f32.mrf.mxu0  ;;  %v2055_v36 = vadd.f32 %v2832_v19, %v2830_v18  ;;  %v1014_v57 = vadd.f32 %v2826_v16, %v2855_v33  ;;  %v2116_v46 = vadd.f32 %v2877_v40, %v2873_v28  ;;  %v2119_v18 = vadd.f32 %v2118_v10, %v2886_v7 }
 0x141   : > { %v1247_v44 = vpack.c.bf16 %v1233_v0, %v1232_v62  ;;  %v1184_v42 = vadd.f32 %v2162_v1, %v1087_v14  ;;  %v2123_v62 = vpop.f32.mrf.mxu1  ;;  %v1103_v0 = vadd.f32 %v2110_v41, %v1006_v56  ;;  %v1022_v7 = vadd.f32 %v2836_v23, %v2855_v33 }
 0x142   : > { %v2164_v6 = vpop.f32.mrf.mxu0  ;;  %v2122_v10 = vadd.f32 %v2121_v39, %v2904_v29  ;;  %v1030_v41 = vadd.f32 %v2846_v30, %v2855_v33 }
 0x143   : > { %v2165_v43 = vadd.f32 %v2164_v6, %v2163_v8  ;;  %2261 = vmatmul.mubr.bf16.vlgmr.msra.gmra.mxu1 %v1247_v44  ;;  %v1234_v55 = vmax.f32 %v1184_v42, 0.0  ;;  %v1106_v8 = vadd.f32 %v2113_v49, %v1009_v12 }
 0x144   : > { %v2166_v13 = vpop.f32.mrf.mxu0  ;;  %2277 = vmatpush3.bf16.msra.mxu1 %v2789_v48 }
 0x145   : > { %v1187_v50 = vadd.f32 %v2165_v43, %v1090_v15  ;;  %2278 = vmatprep.subr.bf16.mxu1 %v2494_v59  ;;  %v1017_v15 = vadd.f32 %v2055_v36, %v2855_v33 }
 0x146   : > { %v2167_v21 = vpop.f32.mrf.mxu0 }
 0x147   : > { %v1235_v48 = vmax.f32 %v1187_v50, 0.0  ;;  %v2168_v22 = vadd.f32 %v2167_v21, %v2166_v13  ;;  %v1111_v50 = vadd.f32 %v2116_v46, %v1014_v57  ;;  %v1114_v21 = vadd.f32 %v2119_v18, %v1017_v15  ;;  %v2502_v57 = vld [vmem:[%s3029_s4 + $0x30] sm:$0xff]   ;;  %v2503_v46 = vld [vmem:[%s3029_s4 + $0x28] sm:$0xff]   ;;  %v2505_v15 = vld [vmem:[%s3029_s4 + $0x18] sm:$0xff]  }
 0x148   : > { %v2169_v2 = vpop.f32.mrf.mxu0  ;;  %2279 = vmatpush3.bf16.msra.mxu1 %v2494_v59  ;;  %v2124_v59 = vpop.f32.mrf.mxu1 }
 0x149   : > { %v1248_v20 = vpack.c.bf16 %v1235_v48, %v1234_v55  ;;  %2280 = vmatprep.subr.bf16.mxu1 %v2495_v4  ;;  %v1192_v24 = vadd.f32 %v2168_v22, %v1095_v17  ;;  %v1025_v22 = vadd.f32 %v2061_v5, %v2855_v33  ;;  %v2125_v17 = vadd.f32 %v2124_v59, %v2123_v62  ;;  %v2500_v59 = vld [vmem:[%s3028_s3] sm:$0xff]  }
 0x14a   : > { %v2170_v52 = vpop.f32.mrf.mxu0  ;;  %v2126_v45 = vpop.f32.mrf.mxu1 }
 0x14b   : > { %v2171_v27 = vadd.f32 %v2170_v52, %v2169_v2  ;;  %2264 = vmatprep.mubr.bf16.mxu1 %v1248_v20  ;;  %v1236_v51 = vmax.f32 %v1192_v24, 0.0  ;;  %v1119_v52 = vadd.f32 %v2122_v10, %v1022_v7  ;;  %v2067_v24 = vadd.f32 %v2857_v34, %v2850_v32 }
 0x14c   : > { %v2172_v53 = vpop.f32.mrf.mxu0  ;;  %2281 = vmatpush3.bf16.msra.mxu1 %v2495_v4  ;;  %v2127_v40 = vpop.f32.mrf.mxu1 }
 0x14d   : > { %v1195_v60 = vadd.f32 %v2171_v27, %v1098_v38  ;;  %2282 = vmatprep.subr.bf16.mxu1 %v2496_v35  ;;  %v1033_v12 = vadd.f32 %v2067_v24, %v2855_v33  ;;  %v2498_v33 = vld [vmem:[%s3028_s3 + $0x10] sm:$0xff]  }
 0x14e   : > { %v2173_v63 = vpop.f32.mrf.mxu0  ;;  %v2129_v26 = vpop.f32.mrf.mxu1 }
 0x14f   : > { %v1237_v58 = vmax.f32 %v1195_v60, 0.0  ;;  %v2174_v61 = vadd.f32 %v2173_v63, %v2172_v53  ;;  %v1122_v53 = vadd.f32 %v2125_v17, %v1025_v22  ;;  %v2128_v60 = vadd.f32 %v2127_v40, %v2126_v45 }
 0x150   : > { %v2175_v9 = vpop.f32.mrf.mxu0  ;;  %2283 = vmatpush3.bf16.msra.mxu1 %v2496_v35  ;;  %v2130_v29 = vpop.f32.mrf.mxu1 }
 0x151   : > { %v1249_v31 = vpack.c.bf16 %v1237_v58, %v1236_v51  ;;  %2284 = vmatprep.subr.bf16.mxu1 %v2497_v11  ;;  %v1200_v14 = vadd.f32 %v2174_v61, %v1103_v0  ;;  %v2131_v49 = vadd.f32 %v2130_v29, %v2129_v26  ;;  %v1127_v34 = vadd.f32 %v2128_v60, %v1030_v41 }
 0x152   : > { %v2176_v1 = vpop.f32.mrf.mxu0 }
 0x153   : > { %v2177_v44 = vadd.f32 %v2176_v1, %v2175_v9  ;;  %2265 = vmatmul.mubr.bf16.gmra.mxu1 %v1249_v31  ;;  %v1238_v19 = vmax.f32 %v1200_v14, 0.0  ;;  %v1130_v0 = vadd.f32 %v2131_v49, %v1033_v12 }
 0x154   : > { %v2178_v3 = vpop.f32.mrf.mxu0  ;;  %2285 = vmatpush3.bf16.msra.mxu1 %v2497_v11 }
 0x155   : > { %v1203_v6 = vadd.f32 %v2177_v44, %v1106_v8  ;;  %2286 = vmatprep.subr.bf16.mxu1 %v2498_v33  ;;  %v2499_v44 = vld [vmem:[%s3028_s3 + $0x8] sm:$0xff]  }
 0x156   : > { %v2179_v42 = vpop.f32.mrf.mxu0 }
 0x157   : > { %v1239_v43 = vmax.f32 %v1203_v6, 0.0  ;;  %v2180_v13 = vadd.f32 %v2179_v42, %v2178_v3  ;;  %v2501_v3 = vld [vmem:[%s3029_s4 + $0x38] sm:$0xff]   ;;  %v2504_v6 = vld [vmem:[%s3029_s4 + $0x20] sm:$0xff]  }
 0x158   : > { %v2181_v47 = vpop.f32.mrf.mxu0  ;;  %2287 = vmatpush3.bf16.msra.mxu1 %v2498_v33  ;;  %2308 = vmatprep.subr.bf16.mxu0 %v2501_v3 }
 0x159   : > { %v1250_v4 = vpack.c.bf16 %v1239_v43, %v1238_v19  ;;  %v1208_v54 = vadd.f32 %v2180_v13, %v1111_v50  ;;  %2288 = vmatprep.subr.bf16.mxu1 %v2499_v44  ;;  %2309 = vmatpush3.bf16.msra.mxu0 %v2501_v3  ;;  %v2967_v19 = vld [vmem:[%s3030_s5 + $0x1] ss:$0 sm:$0xff] }
 0x15a   : > { %v2182_v16 = vpop.f32.mrf.mxu0  ;;  %2310 = vmatprep.subr.bf16.mxu0 %v2502_v57 }
 0x15b   : > { %v2183_v28 = vadd.f32 %v2182_v16, %v2181_v47  ;;  %2268 = vmatprep.mubr.bf16.mxu1 %v1250_v4  ;;  %v1240_v20 = vmax.f32 %v1208_v54, 0.0 }
 0x15c   : > { %v2184_v55 = vpop.f32.mrf.mxu0  ;;  %2289 = vmatpush3.bf16.msra.mxu1 %v2499_v44  ;;  %v2506_v44 = vld [vmem:[%s3029_s4 + $0x10] sm:$0xff]  }
 0x15d   : > { %v1211_v48 = vadd.f32 %v2183_v28, %v1114_v21  ;;  %2290 = vmatprep.subr.bf16.mxu1 %v2500_v59  ;;  %2311 = vmatpush3.bf16.msra.mxu0 %v2502_v57 }
 0x15e   : > { %v2185_v2 = vpop.f32.mrf.mxu0  ;;  %2312 = vmatprep.subr.bf16.mxu0 %v2503_v46 }
 0x15f   : > { %v1241_v35 = vmax.f32 %v1211_v48, 0.0  ;;  %v2186_v25 = vadd.f32 %v2185_v2, %v2184_v55 }
 0x160   : > { %v2187_v37 = vpop.f32.mrf.mxu0  ;;  %2291 = vmatpush3.bf16.msra.mxu1 %v2500_v59  ;;  %v2507_v59 = vld [vmem:[%s3029_s4 + $0x8] sm:$0xff]  }
 0x161   : > { %v1251_v38 = vpack.c.bf16 %v1241_v35, %v1240_v20  ;;  %v1216_v23 = vadd.f32 %v2186_v25, %v1119_v52  ;;  %2340 = vmatprep.subr.bf16.mxu1 %v2501_v3  ;;  %2313 = vmatpush3.bf16.msra.mxu0 %v2503_v46 }
 0x162   : > { %v2188_v27 = vpop.f32.mrf.mxu0  ;;  %2314 = vmatprep.subr.bf16.mxu0 %v2504_v6 }
 0x163   : > { %v2189_v56 = vadd.f32 %v2188_v27, %v2187_v37  ;;  %2269 = vmatmul.mubr.bf16.gmra.mxu1 %v1251_v38  ;;  %v1242_v51 = vmax.f32 %v1216_v23, 0.0 }
 0x164   : > { %v2190_v39 = vpop.f32.mrf.mxu0 }
 0x165   : > { %v1219_v11 = vadd.f32 %v2189_v56, %v1122_v53  ;;  %2315 = vmatpush3.bf16.msra.mxu0 %v2504_v6 }
 0x166   : > { %v2191_v63 = vpop.f32.mrf.mxu0  ;;  %2316 = vmatprep.subr.bf16.mxu0 %v2505_v15 }
 0x167   : > { %v1243_v58 = vmax.f32 %v1219_v11, 0.0  ;;  %v2192_v61 = vadd.f32 %v2191_v63, %v2190_v39 }
 0x168   : > { %v2193_v32 = vpop.f32.mrf.mxu0 }
 0x169   : > { %v1252_v62 = vpack.c.bf16 %v1243_v58, %v1242_v51  ;;  %v1224_v31 = vadd.f32 %v2192_v61, %v1127_v34  ;;  %2317 = vmatpush3.bf16.msra.mxu0 %v2505_v15 }
 0x16a   : > { %v2194_v9 = vpop.f32.mrf.mxu0  ;;  %2318 = vmatprep.subr.bf16.mxu0 %v2506_v44 }
 0x16b   : > { %v2195_v36 = vadd.f32 %v2194_v9, %v2193_v32  ;;  %2272 = vmatprep.mubr.bf16.mxu1 %v1252_v62  ;;  %v1244_v8 = vmax.f32 %v1224_v31, 0.0 }
 0x16d   : > { %v1227_v1 = vadd.f32 %v2195_v36, %v1130_v0  ;;  %2319 = vmatpush3.bf16.msra.mxu0 %v2506_v44 }
 0x16e   : > { %2320 = vmatprep.subr.bf16.mxu0 %v2507_v59 }
 0x16f   : > { %v1245_v30 = vmax.f32 %v1227_v1, 0.0 }
 0x171   : > { %v1253_v14 = vpack.c.bf16 %v1245_v30, %v1244_v8  ;;  %2321 = vmatpush3.bf16.msra.mxu0 %v2507_v59 }
 0x173   : > { %2273 = vmatmul.mubr.bf16.gmra.mxu1 %v1253_v14 }
 0x203   : > { %v2262_v42 = vpop.f32.mrf.mxu1 }
 0x204   : > { %v1365_v47 = vadd.f32 %v2262_v42, %v2967_v19 }
 0x205   : > { %v1356_v18 = vpop.f32.mrf.mxu1 }
 0x206   : > { %v1357_v13 = vadd.f32 %v2967_v19, %v1356_v18  ;;  %v1421_v54 = vmax.f32 %v1365_v47, 0.0 }
 0x207   : > { %v2263_v43 = vpop.f32.mrf.mxu1 }
 0x208   : > { %v1368_v45 = vadd.f32 %v2263_v43, %v2967_v19  ;;  %v1419_v16 = vmax.f32 %v1357_v13, 0.0 }
 0x209   : > { %v1359_v50 = vpop.f32.mrf.mxu1 }
 0x20a   : > { %v1360_v4 = vadd.f32 %v2967_v19, %v1359_v50  ;;  %v1422_v5 = vmax.f32 %v1368_v45, 0.0 }
 0x20c   : > { %v1420_v21 = vmax.f32 %v1360_v4, 0.0  ;;  %v1436_v40 = vpack.c.bf16 %v1422_v5, %v1421_v54 }
 0x20e   : > { %v1435_v28 = vpack.c.bf16 %v1420_v21, %v1419_v16 }
 0x210   : > { %2292 = vmatprep.mubr.bf16.mxu1 %v1435_v28 }
 0x211   : > { %2293 = vmatmul.mubr.bf16.vlgmr.msra.gmra.mxu1 %v1436_v40 }
 0x212   : > { %2348 = vmatpush3.bf16.msra.mxu1 %v2501_v3  ;;  %v2508_v3 = vld [vmem:[%s3029_s4] sm:$0xff]  }
 0x213   : > { %v2266_v55 = vpop.f32.mrf.mxu1  ;;  %2341 = vmatprep.subr.bf16.mxu1 %v2502_v57  ;;  %2322 = vmatprep.subr.bf16.mxu0 %v2508_v3 }
 0x214   : > { %v1381_v2 = vadd.f32 %v2266_v55, %v2967_v19  ;;  %2323 = vmatpush3.bf16.msra.mxu0 %v2508_v3 }
 0x215   : > { %v1372_v7 = vpop.f32.mrf.mxu1 }
 0x216   : > { %2349 = vmatpush3.bf16.msra.mxu1 %v2502_v57  ;;  %v1373_v48 = vadd.f32 %v2967_v19, %v1372_v7  ;;  %v1425_v37 = vmax.f32 %v1381_v2, 0.0 }
 0x217   : > { %v2267_v10 = vpop.f32.mrf.mxu1  ;;  %2342 = vmatprep.subr.bf16.mxu1 %v2503_v46 }
 0x218   : > { %v1384_v22 = vadd.f32 %v2267_v10, %v2967_v19  ;;  %v1423_v25 = vmax.f32 %v1373_v48, 0.0 }
 0x219   : > { %v1375_v17 = vpop.f32.mrf.mxu1 }
 0x21a   : > { %v1376_v20 = vadd.f32 %v2967_v19, %v1375_v17  ;;  %2350 = vmatpush3.bf16.msra.mxu1 %v2503_v46  ;;  %v1426_v35 = vmax.f32 %v1384_v22, 0.0 }
 0x21b   : > { %2343 = vmatprep.subr.bf16.mxu1 %v2504_v6 }
 0x21c   : > { %v1424_v26 = vmax.f32 %v1376_v20, 0.0  ;;  %v1438_v38 = vpack.c.bf16 %v1426_v35, %v1425_v37 }
 0x21e   : > { %v1437_v52 = vpack.c.bf16 %v1424_v26, %v1423_v25  ;;  %2351 = vmatpush3.bf16.msra.mxu1 %v2504_v6  ;;  %v1984_v6 = vld [vmem:[%s3030_s5 + $0x2] ss:$0 sm:$0xff] }
 0x21f   : > { %2344 = vmatprep.subr.bf16.mxu1 %v2505_v15 }
 0x220   : > { %2296 = vmatprep.mubr.bf16.mxu1 %v1437_v52 }
 0x221   : > { %2297 = vmatmul.mubr.bf16.gmra.mxu1 %v1438_v38 }
 0x222   : > { %2352 = vmatpush3.bf16.msra.mxu1 %v2505_v15 }
 0x223   : > { %v2270_v24 = vpop.f32.mrf.mxu1  ;;  %2345 = vmatprep.subr.bf16.mxu1 %v2506_v44 }
 0x224   : > { %v1397_v29 = vadd.f32 %v2270_v24, %v2967_v19 }
 0x225   : > { %v1388_v27 = vpop.f32.mrf.mxu1 }
 0x226   : > { %v1389_v23 = vadd.f32 %v2967_v19, %v1388_v27  ;;  %v1429_v63 = vmax.f32 %v1397_v29, 0.0  ;;  %2353 = vmatpush3.bf16.msra.mxu1 %v2506_v44 }
 0x227   : > { %v2271_v53 = vpop.f32.mrf.mxu1  ;;  %2346 = vmatprep.subr.bf16.mxu1 %v2507_v59 }
 0x228   : > { %v1400_v56 = vadd.f32 %v2271_v53, %v2967_v19  ;;  %v1427_v11 = vmax.f32 %v1389_v23, 0.0 }
 0x229   : > { %v1391_v39 = vpop.f32.mrf.mxu1 }
 0x22a   : > { %v1392_v41 = vadd.f32 %v2967_v19, %v1391_v39  ;;  %v1430_v60 = vmax.f32 %v1400_v56, 0.0  ;;  %2354 = vmatpush3.bf16.msra.mxu1 %v2507_v59 }
 0x22b   : > { %2347 = vmatprep.subr.bf16.mxu1 %v2508_v3 }
 0x22c   : > { %v1428_v12 = vmax.f32 %v1392_v41, 0.0  ;;  %v1440_v51 = vpack.c.bf16 %v1430_v60, %v1429_v63 }
 0x22e   : > { %v1439_v49 = vpack.c.bf16 %v1428_v12, %v1427_v11  ;;  %2355 = vmatpush3.bf16.msra.mxu1 %v2508_v3 }
 0x230   : > { %2300 = vmatprep.mubr.bf16.mxu1 %v1439_v49 }
 0x231   : > { %2301 = vmatmul.mubr.bf16.gmra.mxu1 %v1440_v51 }
 0x233   : > { %v2274_v58 = vpop.f32.mrf.mxu1 }
 0x234   : > { %v1413_v9 = vadd.f32 %v2274_v58, %v2967_v19 }
 0x235   : > { %v1404_v61 = vpop.f32.mrf.mxu1 }
 0x236   : > { %v1405_v34 = vadd.f32 %v2967_v19, %v1404_v61  ;;  %v1433_v30 = vmax.f32 %v1413_v9, 0.0 }
 0x237   : > { %v2275_v32 = vpop.f32.mrf.mxu1 }
 0x238   : > { %v1416_v62 = vadd.f32 %v2275_v32, %v2967_v19  ;;  %v1431_v1 = vmax.f32 %v1405_v34, 0.0 }
 0x239   : > { %v1407_v0 = vpop.f32.mrf.mxu1 }
 0x23a   : > { %v1408_v31 = vadd.f32 %v2967_v19, %v1407_v0  ;;  %v1434_v36 = vmax.f32 %v1416_v62, 0.0 }
 0x23c   : > { %v1432_v8 = vmax.f32 %v1408_v31, 0.0  ;;  %v1442_v33 = vpack.c.bf16 %v1434_v36, %v1433_v30 }
 0x23e   : > { %v1441_v14 = vpack.c.bf16 %v1432_v8, %v1431_v1  ;;  %v1993_v8 = vld [vmem:[%s3030_s5 + $0x3] ss:$0 sm:$0xff] }
 0x240   : > { %2304 = vmatprep.mubr.bf16.mxu1 %v1441_v14 }
 0x241   : > { %2305 = vmatmul.mubr.bf16.gmra.mxu1 %v1442_v33 }
 0x2d1   : > { %v2294_v57 = vpop.f32.mrf.mxu1 }
 0x2d2   : > { %v1554_v19 = vadd.f32 %v2294_v57, %v1984_v6 }
 0x2d3   : > { %v1545_v46 = vpop.f32.mrf.mxu1 }
 0x2d4   : > { %v1546_v42 = vadd.f32 %v1984_v6, %v1545_v46  ;;  %v1610_v4 = vmax.f32 %v1554_v19, 0.0 }
 0x2d5   : > { %v2295_v15 = vpop.f32.mrf.mxu1 }
 0x2d6   : > { %v1557_v18 = vadd.f32 %v2295_v15, %v1984_v6  ;;  %v1608_v47 = vmax.f32 %v1546_v42, 0.0 }
 0x2d7   : > { %v1548_v43 = vpop.f32.mrf.mxu1 }
 0x2d8   : > { %v1549_v13 = vadd.f32 %v1984_v6, %v1548_v43  ;;  %v1611_v45 = vmax.f32 %v1557_v18, 0.0 }
 0x2da   : > { %v1609_v50 = vmax.f32 %v1549_v13, 0.0  ;;  %v1625_v16 = vpack.c.bf16 %v1611_v45, %v1610_v4 }
 0x2dc   : > { %v1624_v5 = vpack.c.bf16 %v1609_v50, %v1608_v47 }
 0x2de   : > { %2324 = vmatprep.mubr.bf16.mxu0 %v1624_v5 }
 0x2df   : > { %2325 = vmatmul.mubr.bf16.vlgmr.msra.gmra.mxu0 %v1625_v16 }
 0x2e1   : > { %v2298_v21 = vpop.f32.mrf.mxu1 }
 0x2e2   : > { %v1570_v7 = vadd.f32 %v2298_v21, %v1984_v6 }
 0x2e3   : > { %v1561_v54 = vpop.f32.mrf.mxu1 }
 0x2e4   : > { %v1562_v40 = vadd.f32 %v1984_v6, %v1561_v54  ;;  %v1614_v20 = vmax.f32 %v1570_v7, 0.0 }
 0x2e5   : > { %v2299_v28 = vpop.f32.mrf.mxu1 }
 0x2e6   : > { %v1573_v55 = vadd.f32 %v2299_v28, %v1984_v6  ;;  %v1612_v2 = vmax.f32 %v1562_v40, 0.0 }
 0x2e7   : > { %v1564_v10 = vpop.f32.mrf.mxu1 }
 0x2e8   : > { %v1565_v48 = vadd.f32 %v1984_v6, %v1564_v10  ;;  %v1615_v22 = vmax.f32 %v1573_v55, 0.0 }
 0x2ea   : > { %v1613_v17 = vmax.f32 %v1565_v48, 0.0  ;;  %v1627_v25 = vpack.c.bf16 %v1615_v22, %v1614_v20 }
 0x2ec   : > { %v1626_v35 = vpack.c.bf16 %v1613_v17, %v1612_v2 }
 0x2ee   : > { %2328 = vmatprep.mubr.bf16.mxu0 %v1626_v35 }
 0x2ef   : > { %2329 = vmatmul.mubr.bf16.gmra.mxu0 %v1627_v25 }
 0x2f1   : > { %v2302_v26 = vpop.f32.mrf.mxu1 }
 0x2f2   : > { %v1586_v27 = vadd.f32 %v2302_v26, %v1984_v6 }
 0x2f3   : > { %v1577_v37 = vpop.f32.mrf.mxu1 }
 0x2f4   : > { %v1578_v38 = vadd.f32 %v1984_v6, %v1577_v37  ;;  %v1618_v41 = vmax.f32 %v1586_v27, 0.0 }
 0x2f5   : > { %v2303_v52 = vpop.f32.mrf.mxu1 }
 0x2f6   : > { %v1589_v24 = vadd.f32 %v2303_v52, %v1984_v6  ;;  %v1616_v29 = vmax.f32 %v1578_v38, 0.0 }
 0x2f7   : > { %v1580_v53 = vpop.f32.mrf.mxu1 }
 0x2f8   : > { %v1581_v23 = vadd.f32 %v1984_v6, %v1580_v53  ;;  %v1619_v56 = vmax.f32 %v1589_v24, 0.0 }
 0x2fa   : > { %v1617_v39 = vmax.f32 %v1581_v23, 0.0  ;;  %v1629_v11 = vpack.c.bf16 %v1619_v56, %v1618_v41 }
 0x2fc   : > { %v1628_v60 = vpack.c.bf16 %v1617_v39, %v1616_v29 }
 0x2fe   : > { %2332 = vmatprep.mubr.bf16.mxu1 %v1628_v60 }
 0x2ff   : > { %2333 = vmatmul.mubr.bf16.vlgmr.msra.gmra.mxu1 %v1629_v11 }
 0x301   : > { %v2306_v12 = vpop.f32.mrf.mxu1 }
 0x302   : > { %v1602_v61 = vadd.f32 %v2306_v12, %v1984_v6 }
 0x303   : > { %v1593_v63 = vpop.f32.mrf.mxu1 }
 0x304   : > { %v1594_v51 = vadd.f32 %v1984_v6, %v1593_v63  ;;  %v1622_v31 = vmax.f32 %v1602_v61, 0.0 }
 0x305   : > { %v2307_v49 = vpop.f32.mrf.mxu1 }
 0x306   : > { %v1605_v58 = vadd.f32 %v2307_v49, %v1984_v6  ;;  %v1620_v9 = vmax.f32 %v1594_v51, 0.0 }
 0x307   : > { %v1596_v32 = vpop.f32.mrf.mxu1 }
 0x308   : > { %v1597_v34 = vadd.f32 %v1984_v6, %v1596_v32  ;;  %v1623_v62 = vmax.f32 %v1605_v58, 0.0 }
 0x30a   : > { %v1621_v0 = vmax.f32 %v1597_v34, 0.0  ;;  %v1631_v1 = vpack.c.bf16 %v1623_v62, %v1622_v31 }
 0x30c   : > { %v1630_v36 = vpack.c.bf16 %v1621_v0, %v1620_v9 }
 0x30e   : > { %2336 = vmatprep.mubr.bf16.mxu1 %v1630_v36 }
 0x30f   : > { %2337 = vmatmul.mubr.bf16.gmra.mxu1 %v1631_v1 }
 0x39f   : > { %v2326_v30 = vpop.f32.mrf.mxu0 }
 0x3a0   : > { %v1743_v14 = vadd.f32 %v2326_v30, %v1993_v8 }
 0x3a1   : > { %v1734_v33 = vpop.f32.mrf.mxu0 }
 0x3a2   : > { %1799 = vst [vmem:[%s3004_s30 + $0x10] sm:$0xff] %v1743_v14  ;;  %v1735_v44 = vadd.f32 %v1993_v8, %v1734_v33 }
 0x3a3   : > { %v2327_v59 = vpop.f32.mrf.mxu0 }
 0x3a4   : > { %1797 = vst [vmem:[%s3004_s30] sm:$0xff] %v1735_v44  ;;  %v1746_v3 = vadd.f32 %v2327_v59, %v1993_v8 }
 0x3a5   : > { %v1737_v57 = vpop.f32.mrf.mxu0 }
 0x3a6   : > { %1800 = vst [vmem:[%s3004_s30 + $0x18] sm:$0xff] %v1746_v3  ;;  %v1738_v46 = vadd.f32 %v1993_v8, %v1737_v57 }
 0x3a8   : > { %1798 = vst [vmem:[%s3004_s30 + $0x8] sm:$0xff] %v1738_v46 }
 0x3af   : > { %v2330_v6 = vpop.f32.mrf.mxu0 }
 0x3b0   : > { %v1759_v15 = vadd.f32 %v2330_v6, %v1993_v8 }
 0x3b1   : > { %v1750_v42 = vpop.f32.mrf.mxu0 }
 0x3b2   : > { %1803 = vst [vmem:[%s3004_s30 + $0x30] sm:$0xff] %v1759_v15  ;;  %v1751_v18 = vadd.f32 %v1993_v8, %v1750_v42 }
 0x3b3   : > { %v2331_v19 = vpop.f32.mrf.mxu0 }
 0x3b4   : > { %1801 = vst [vmem:[%s3004_s30 + $0x20] sm:$0xff] %v1751_v18  ;;  %v1762_v43 = vadd.f32 %v2331_v19, %v1993_v8 }
 0x3b5   : > { %v1753_v13 = vpop.f32.mrf.mxu0 }
 0x3b6   : > { %1804 = vst [vmem:[%s3004_s30 + $0x38] sm:$0xff] %v1762_v43  ;;  %v1754_v45 = vadd.f32 %v1993_v8, %v1753_v13 }
 0x3b8   : > { %1802 = vst [vmem:[%s3004_s30 + $0x28] sm:$0xff] %v1754_v45 }
 0x3bf   : > { %v2334_v47 = vpop.f32.mrf.mxu1 }
 0x3c0   : > { %v1775_v50 = vadd.f32 %v2334_v47, %v1993_v8 }
 0x3c1   : > { %v1766_v4 = vpop.f32.mrf.mxu1 }
 0x3c2   : > { %1807 = vst [vmem:[%s3004_s30 + $0x50] sm:$0xff] %v1775_v50  ;;  %v1767_v5 = vadd.f32 %v1993_v8, %v1766_v4 }
 0x3c3   : > { %v2335_v16 = vpop.f32.mrf.mxu1 }
 0x3c4   : > { %1805 = vst [vmem:[%s3004_s30 + $0x40] sm:$0xff] %v1767_v5  ;;  %v1778_v21 = vadd.f32 %v2335_v16, %v1993_v8 }
 0x3c5   : > { %v1769_v54 = vpop.f32.mrf.mxu1 }
 0x3c6   : > { %1808 = vst [vmem:[%s3004_s30 + $0x58] sm:$0xff] %v1778_v21  ;;  %v1770_v28 = vadd.f32 %v1993_v8, %v1769_v54 }
 0x3c8   : > { %1806 = vst [vmem:[%s3004_s30 + $0x48] sm:$0xff] %v1770_v28 }
 0x3cf   : > { %v2338_v40 = vpop.f32.mrf.mxu1 }
 0x3d0   : > { %v1791_v55 = vadd.f32 %v2338_v40, %v1993_v8 }
 0x3d1   : > { %v1782_v7 = vpop.f32.mrf.mxu1 }
 0x3d2   : > { %1811 = vst [vmem:[%s3004_s30 + $0x70] sm:$0xff] %v1791_v55  ;;  %v1783_v10 = vadd.f32 %v1993_v8, %v1782_v7 }
 0x3d3   : > { %v2339_v48 = vpop.f32.mrf.mxu1 }
 0x3d4   : > { %1809 = vst [vmem:[%s3004_s30 + $0x60] sm:$0xff] %v1783_v10  ;;  %v1794_v22 = vadd.f32 %v2339_v48, %v1993_v8 }
 0x3d5   : > { %v1785_v2 = vpop.f32.mrf.mxu1 }
 0x3d6   : > { %1812 = vst [vmem:[%s3004_s30 + $0x78] sm:$0xff] %v1794_v22  ;;  %v1786_v17 = vadd.f32 %v1993_v8, %v1785_v2 }
 0x3d8   : > { %1810 = vst [vmem:[%s3004_s30 + $0x68] sm:$0xff] %v1786_v17 }
 0x3d9 PF: > { %s16_s21 = sadd.s32 1, %s2515_s21  }
 0x3da   : > { %p13_p4 = scmp.ge.s32.totalorder %s16_s21, 4  }
 0x3dc   :  { %15 = sbr.rel (!%p13_p4) target bundleno = 1 (0x1), region = 74 }

</bundles_post_ra>
